<compile_context>
chip_gen: v7x
topology: tpu7x:2x2x1
jax: 0.10.0
libtpu: 0.0.40
codegen_flags: <defaults>
</compile_context>

<pallas_src>
import jax
import jax.numpy as jnp
from jax.experimental import pallas as pl
from jax.experimental.pallas import tpu as pltpu


# ----------------------------------------------------------------------------
# Helpers
# ----------------------------------------------------------------------------
def _round_up(v, m):
    return (v + m - 1) // m * m


def _pad2d(x, rows, cols):
    r, c = x.shape
    return jnp.pad(x, ((0, rows - r), (0, cols - c)))


def _choose_tiles(n, tile_m_max, tile_k_max):
    """Pick (tile_m, tile_k, n_pad).

    N is padded only to a multiple of tile_m; tile_k is the largest multiple
    of tile_m that divides n_pad and is <= tile_k_max (so padding waste is at
    most tile_m - 1 rows, independent of tile_k).
    """
    tile_m = min(tile_m_max, _round_up(n, 128))  # multiple of 128 by construction
    n_pad = _round_up(n, tile_m)
    n_blocks = n_pad // tile_m
    d_best = 1
    for d in range(1, n_blocks + 1):
        if n_blocks % d == 0 and tile_m * d <= tile_k_max:
            d_best = d
    return tile_m, tile_m * d_best, n_pad


# ----------------------------------------------------------------------------
# Fused GCN-layer kernel:  out = relu(A_hat @ (X @ W) + b) (+1)
# ----------------------------------------------------------------------------
def _make_layer_kernel(add_one, x_resident, tile_k):
    def kernel(a_ref, x_ref, w_ref, b_ref, o_ref, acc_ref):
        k = pl.program_id(1)

        @pl.when(k == 0)
        def _init():
            acc_ref[...] = jnp.zeros_like(acc_ref)

        if x_resident:
            # Full X lives in VMEM (fetched once); slice the k-th row band.
            start = pl.multiple_of(k * tile_k, tile_k)
            x_tile = x_ref[pl.ds(start, tile_k), :]
        else:
            x_tile = x_ref[...]

        # Fused theta: (tile_k, f_in) @ (f_in, f_out) on the MXU, f32
        # accumulation, cast back to bf16 for the A matmul (same precision as
        # a separate theta pass would give).
        xw = jnp.dot(x_tile, w_ref[...], preferred_element_type=jnp.float32)
        xw = xw.astype(a_ref.dtype)

        # Propagation inner step: (tile_m, tile_k) @ (tile_k, f_out), f32 acc.
        acc_ref[...] += jnp.dot(a_ref[...], xw, preferred_element_type=jnp.float32)

        # Bias / relu / (+1) applied once, after the full k-reduction.
        @pl.when(k == pl.num_programs(1) - 1)
        def _finalize():
            o = jnp.maximum(acc_ref[...] + b_ref[...], 0.0)
            if add_one:
                o = o + 1.0
            o_ref[...] = o.astype(o_ref.dtype)

    return kernel


def _gcn_layer(a, x, w, b, *, tile_m, tile_k, add_one, out_dtype, x_resident):
    """One fused GCN layer over padded operands."""
    n_pad = a.shape[0]
    f_in = x.shape[1]
    f_out = w.shape[1]
    n_m = n_pad // tile_m
    n_k = n_pad // tile_k
    grid = (n_m, n_k)
    out_itemsize = jnp.dtype(out_dtype).itemsize

    if x_resident:
        x_spec = pl.BlockSpec((n_pad, f_in), lambda i, k: (0, 0))
        x_hbm_bytes = n_pad * f_in * x.dtype.itemsize            # fetched once
        x_vmem_rows = n_pad
    else:
        x_spec = pl.BlockSpec((tile_k, f_in), lambda i, k: (k, 0))
        x_hbm_bytes = n_pad * f_in * x.dtype.itemsize * n_m      # re-streamed per row tile
        x_vmem_rows = tile_k

    # Explicit VMEM budget (double-buffered inputs/outputs + f32 accumulator).
    vmem_est = (
        2 * tile_m * tile_k * a.dtype.itemsize        # A tile
        + 2 * x_vmem_rows * f_in * x.dtype.itemsize   # X (resident or tile)
        + 2 * f_in * f_out * w.dtype.itemsize         # W
        + 2 * 8 * 128 * 4                             # bias (padded layout)
        + 2 * tile_m * f_out * out_itemsize           # output tile
        + tile_m * f_out * 4                          # accumulator scratch
    )
    vmem_limit_bytes = int(min(48 << 20, max(32 << 20, 2 * vmem_est)))

    return pl.pallas_call(
        _make_layer_kernel(add_one, x_resident, tile_k),
        out_shape=jax.ShapeDtypeStruct((n_pad, f_out), out_dtype),
        grid_spec=pltpu.PrefetchScalarGridSpec(
            num_scalar_prefetch=0,
            grid=grid,
            in_specs=[
                pl.BlockSpec((tile_m, tile_k), lambda i, k: (i, k)),   # A_hat tile
                x_spec,                                                # X (resident / tiled)
                pl.BlockSpec((f_in, f_out), lambda i, k: (0, 0)),      # W (resident)
                pl.BlockSpec((1, f_out), lambda i, k: (0, 0)),         # bias
            ],
            out_specs=pl.BlockSpec((tile_m, f_out), lambda i, k: (i, 0)),
            scratch_shapes=[pltpu.VMEM((tile_m, f_out), jnp.float32)],
        ),
        compiler_params=pltpu.CompilerParams(
            dimension_semantics=("parallel", "arbitrary"),
            vmem_limit_bytes=vmem_limit_bytes,
        ),
        cost_estimate=pl.CostEstimate(
            flops=2 * n_pad * n_pad * f_out            # A @ XW
            + 2 * n_pad * f_in * f_out * n_m,          # fused theta (recomputed per row tile)
            transcendentals=0,
            bytes_accessed=(
                n_pad * n_pad * a.dtype.itemsize
                + x_hbm_bytes
                + f_in * f_out * w.dtype.itemsize
                + f_out * b.dtype.itemsize
                + n_pad * f_out * out_itemsize
            ),
        ),
    )(a, x, w, b)


# ----------------------------------------------------------------------------
# Full forward
# ----------------------------------------------------------------------------
def gcn_net_true_s_forward(
    a_hat, x, w1, b1, w2, b2, *,
    tile_m_max=512, tile_k_max=2048,
    compute_dtype=jnp.bfloat16,
    x_resident_budget=8 << 20,
):
    """Two-layer GCN forward.

    a_hat : [N, N] dense normalized adjacency  D^-1/2 (A+I) D^-1/2
    x     : [N, F_in],  w1: [F_in, H], b1: [1, H], w2: [H, F_out], b2: [1, F_out]
    Returns (out [N, F_out] float32, c [1,1]).
    """
    n, f_in = x.shape
    h_dim = w1.shape[1]
    f_out = w2.shape[1]
    cdt = jnp.dtype(compute_dtype)

    tile_m, tile_k, n_pad = _choose_tiles(n, tile_m_max, tile_k_max)
    # Keep feature dims at 128 lanes: the kernel is HBM-bound on A, so wider
    # padding would only add XW traffic / MXU work.
    h_pad = _round_up(h_dim, 128)
    o_pad = _round_up(f_out, 128)

    # Zero padding is inert: padded A rows/cols are zero, padded weight/bias
    # entries are zero, and padded rows/cols are sliced off at the end.
    a_c = _pad2d(a_hat, n_pad, n_pad).astype(compute_dtype)
    x_c = _pad2d(x, n_pad, f_in).astype(compute_dtype)
    w1_c = _pad2d(w1, f_in, h_pad).astype(compute_dtype)
    b1_p = _pad2d(b1, 1, h_pad).astype(jnp.float32)
    w2_c = _pad2d(w2, h_pad, o_pad).astype(compute_dtype)
    b2_p = _pad2d(b2, 1, o_pad).astype(jnp.float32)

    # Layer 1 (fused theta + propagate).  Output stays bf16 for cheap streaming
    # into layer 2.
    x1_resident = 2 * n_pad * f_in * cdt.itemsize <= x_resident_budget
    h = _gcn_layer(a_c, x_c, w1_c, b1_p,
                   tile_m=tile_m, tile_k=tile_k, add_one=False,
                   out_dtype=compute_dtype, x_resident=x1_resident)
    # TODO(synk): F.dropout with p=drop_prob=0 (and eval mode) is the identity -> omitted.

    # Layer 2 (needs all rows of h, so it is a separate pass over A_hat).
    x2_resident = 2 * n_pad * h_pad * cdt.itemsize <= x_resident_budget
    out_pad = _gcn_layer(a_c, h, w2_c, b2_p,
                         tile_m=tile_m, tile_k=tile_k, add_one=True,
                         out_dtype=jnp.float32, x_resident=x2_resident)

    out = out_pad[:n, :f_out]
    c = jnp.ones((1, 1), dtype=jnp.float32)  # self.c parameter (constant)
    return out, c


# ----------------------------------------------------------------------------
# Glue (plain JAX): dense GCN normalization and parameter init
# ----------------------------------------------------------------------------
def build_normalized_adjacency(edge_index, edge_weight, num_nodes):
    """A_hat = D^-1/2 (A + I) D^-1/2, with A_hat[i, j] = weight of j -> i."""
    row, col = edge_index[0], edge_index[1]
    a = jnp.zeros((num_nodes, num_nodes), dtype=jnp.float32)
    a = a.at[col, row].add(edge_weight)              # A[target, source] += w
    a = a + jnp.eye(num_nodes, dtype=jnp.float32)    # self loops (fill=1)
    deg = jnp.sum(a, axis=1)
    dinv = jnp.where(deg > 0, 1.0 / jnp.sqrt(deg), 0.0)
    return dinv[:, None] * a * dinv[None, :]


def init_params(key, in_dim, hidden_dim, out_dim):
    """Glorot weights; small random biases (to exercise the bias path)."""
    k1, k2, k3, k4 = jax.random.split(key, 4)

    def glorot(k, fan_in, fan_out):
        s = jnp.sqrt(6.0 / (fan_in + fan_out))
        return jax.random.uniform(k, (fan_in, fan_out), jnp.float32, -s, s)

    w1 = glorot(k1, in_dim, hidden_dim)
    b1 = 0.5 * jax.random.normal(k3, (1, hidden_dim), dtype=jnp.float32)
    w2 = glorot(k2, hidden_dim, out_dim)
    b2 = 0.5 * jax.random.normal(k4, (1, out_dim), dtype=jnp.float32)
    return w1, b1, w2, b2


if __name__ == "__main__":
    # Small shapes consistent with the module: a 200-node graph, 16 input
    # features, hidden_dim=32, out_dim=8.
    num_nodes, in_dim, hidden_dim, out_dim = 200, 16, 32, 8
    num_edges = 800

    key = jax.random.PRNGKey(0)
    kx, ke, kw, kp = jax.random.split(key, 4)

    x = jax.random.normal(kx, (num_nodes, in_dim), dtype=jnp.float32)
    edge_index = jax.random.randint(ke, (2, num_edges), 0, num_nodes)
    edge_weight = jax.random.uniform(kw, (num_edges,), jnp.float32, 0.1, 1.0)

    a_hat = build_normalized_adjacency(edge_index, edge_weight, num_nodes)
    w1, b1, w2, b2 = init_params(kp, in_dim, hidden_dim, out_dim)

    # Pure-JAX f32 reference of the module's forward pass.  The kernel streams
    # in bf16 with f32 accumulation, so compare with a bf16-level tolerance.
    ref_h = jnp.maximum(a_hat @ (x @ w1) + b1, 0.0)
    ref_o = jnp.maximum(a_hat @ (ref_h @ w2) + b2, 0.0) + 1.0

    # 1) Default (large-tile) configuration: n_pad=256, single-tile grid,
    #    X/H VMEM-resident.
    out, c = gcn_net_true_s_forward(a_hat, x, w1, b1, w2, b2)
    jax.block_until_ready(out)
    jax.block_until_ready(c)
    assert out.shape == (num_nodes, out_dim)
    assert out.dtype == jnp.float32
    assert c.shape == (1, 1)
    assert jnp.allclose(out, ref_o, atol=3e-2, rtol=3e-2), (
        float(jnp.max(jnp.abs(out - ref_o)))
    )

    # 2) Small-tile configuration with residency disabled: exercises the
    #    (2, 2) grid, the k-reduction accumulator path and the k-tiled X path.
    out2, _ = gcn_net_true_s_forward(
        a_hat, x, w1, b1, w2, b2,
        tile_m_max=128, tile_k_max=128, x_resident_budget=0,
    )
    jax.block_until_ready(out2)
    assert jnp.allclose(out2, ref_o, atol=3e-2, rtol=3e-2), (
        float(jnp.max(jnp.abs(out2 - ref_o)))
    )

    print("KERNEL_OK")
</pallas_src>

<mosaic_0001>
module attributes {stable_mosaic.version = 11 : i64} {
  func.func @kernel(%arg0: i32, %arg1: i32, %arg2: memref<256x256xbf16, #tpu.memory_space<vmem>>, %arg3: memref<256x16xbf16, #tpu.memory_space<vmem>>, %arg4: memref<16x128xbf16, #tpu.memory_space<vmem>>, %arg5: memref<1x128xf32, #tpu.memory_space<vmem>>, %arg6: memref<256x128xbf16, #tpu.memory_space<vmem>>, %arg7: memref<256x128xf32, #tpu.memory_space<vmem>>) attributes {dimension_semantics = [#tpu.dimension_semantics<parallel>, #tpu.dimension_semantics<arbitrary>], iteration_bounds = array<i64: 1, 1>, scalar_prefetch = 0 : i64, scratch_operands = 1 : i64, tpu.core_type = #tpu.core_type<tc>, window_params = [{transform_indices = @transform_0, window_bounds = array<i64: 256, 256>}, {pipeline_mode = #tpu.pipeline_mode<synchronous>, transform_indices = @transform_1, window_bounds = array<i64: 256, 16>}, {pipeline_mode = #tpu.pipeline_mode<synchronous>, transform_indices = @transform_2, window_bounds = array<i64: 16, 128>}, {pipeline_mode = #tpu.pipeline_mode<synchronous>, transform_indices = @transform_3, window_bounds = array<i64: 1, 128>}, {transform_indices = @transform_4, window_bounds = array<i64: 256, 128>}]} {
    %c0_i32 = arith.constant 0 : i32
    %0 = arith.cmpi eq, %arg1, %c0_i32 : i32
    %1 = arith.extui %0 : i1 to i32
    %c0_i32_0 = arith.constant 0 : i32
    %2 = arith.cmpi ne, %1, %c0_i32_0 : i32
    scf.if %2 {
      %cst_12 = arith.constant 0.000000e+00 : f32
      %18 = vector.broadcast %cst_12 : f32 to vector<256x128xf32>
      %c0_13 = arith.constant 0 : index
      %c0_14 = arith.constant 0 : index
      %19 = vector.load %arg7[%c0_13, %c0_14] : memref<256x128xf32, #tpu.memory_space<vmem>>, vector<256x128xf32>
      tpu.vector_store %arg7[%c0_13, %c0_14], %18 {strides = array<i32>} : memref<256x128xf32, #tpu.memory_space<vmem>>, vector<256x128xf32>,
    } else {
    }
    %c256_i32 = arith.constant 256 : i32
    %3 = arith.muli %arg1, %c256_i32 : i32
    %4 = tpu.assume_multiple %3, 256 : i32
    %5 = arith.index_cast %4 : i32 to index
    %c0 = arith.constant 0 : index
    %6 = vector.load %arg3[%5, %c0] : memref<256x16xbf16, #tpu.memory_space<vmem>>, vector<256x16xbf16>
    %c0_1 = arith.constant 0 : index
    %c0_2 = arith.constant 0 : index
    %7 = vector.load %arg4[%c0_1, %c0_2] : memref<16x128xbf16, #tpu.memory_space<vmem>>, vector<16x128xbf16>
    %cst = arith.constant dense<0.000000e+00> : vector<256x128xf32>
    %8 = tpu.matmul %6, %7, %cst {dimension_numbers = #tpu.dot_dimension_numbers<[1], [0], [0], [1], [0, 0, 1, 1], [], []>} : vector<256x16xbf16>, vector<16x128xbf16>, vector<256x128xf32> -> vector<256x128xf32>
    %9 = arith.truncf %8 : vector<256x128xf32> to vector<256x128xbf16>
    %c0_3 = arith.constant 0 : index
    %c0_4 = arith.constant 0 : index
    %10 = vector.load %arg7[%c0_3, %c0_4] : memref<256x128xf32, #tpu.memory_space<vmem>>, vector<256x128xf32>
    %c0_5 = arith.constant 0 : index
    %c0_6 = arith.constant 0 : index
    %11 = vector.load %arg2[%c0_5, %c0_6] : memref<256x256xbf16, #tpu.memory_space<vmem>>, vector<256x256xbf16>
    %cst_7 = arith.constant dense<0.000000e+00> : vector<256x128xf32>
    %12 = tpu.matmul %11, %9, %cst_7 {dimension_numbers = #tpu.dot_dimension_numbers<[1], [0], [0], [1], [0, 0, 1, 1], [], []>} : vector<256x256xbf16>, vector<256x128xbf16>, vector<256x128xf32> -> vector<256x128xf32>
    %13 = arith.addf %10, %12 : vector<256x128xf32>
    %c0_8 = arith.constant 0 : index
    %c0_9 = arith.constant 0 : index
    %14 = vector.load %arg7[%c0_8, %c0_9] : memref<256x128xf32, #tpu.memory_space<vmem>>, vector<256x128xf32>
    tpu.vector_store %arg7[%c0_8, %c0_9], %13 {strides = array<i32>} : memref<256x128xf32, #tpu.memory_space<vmem>>, vector<256x128xf32>,
    %c0_i32_10 = arith.constant 0 : i32
    %15 = arith.cmpi eq, %arg1, %c0_i32_10 : i32
    %16 = arith.extui %15 : i1 to i32
    %c0_i32_11 = arith.constant 0 : i32
    %17 = arith.cmpi ne, %16, %c0_i32_11 : i32
    scf.if %17 {
      %c0_12 = arith.constant 0 : index
      %c0_13 = arith.constant 0 : index
      %18 = vector.load %arg7[%c0_12, %c0_13] : memref<256x128xf32, #tpu.memory_space<vmem>>, vector<256x128xf32>
      %c0_14 = arith.constant 0 : index
      %c0_15 = arith.constant 0 : index
      %19 = vector.load %arg5[%c0_14, %c0_15] : memref<1x128xf32, #tpu.memory_space<vmem>>, vector<1x128xf32>
      %20 = vector.broadcast %19 : vector<1x128xf32> to vector<256x128xf32>
      %21 = arith.addf %18, %20 : vector<256x128xf32>
      %cst_16 = arith.constant 0.000000e+00 : f32
      %22 = vector.broadcast %cst_16 : f32 to vector<256x128xf32>
      %23 = arith.maximumf %21, %22 : vector<256x128xf32>
      %24 = arith.truncf %23 : vector<256x128xf32> to vector<256x128xbf16>
      %c0_17 = arith.constant 0 : index
      %c0_18 = arith.constant 0 : index
      %25 = vector.load %arg6[%c0_17, %c0_18] : memref<256x128xbf16, #tpu.memory_space<vmem>>, vector<256x128xbf16>
      tpu.vector_store %arg6[%c0_17, %c0_18], %24 {strides = array<i32>} : memref<256x128xbf16, #tpu.memory_space<vmem>>, vector<256x128xbf16>,
    } else {
    }
    return
  }
  func.func @transform_0(%arg0: i32, %arg1: i32) -> (i32, i32) {
    %c0_i32 = arith.constant 0 : i32
    return %arg0, %arg1 : i32, i32
  }
  func.func @transform_1(%arg0: i32, %arg1: i32) -> (i32, i32) {
    %c0_i32 = arith.constant 0 : i32
    %c0_i32_0 = arith.constant 0 : i32
    %c0_i32_1 = arith.constant 0 : i32
    return %c0_i32, %c0_i32_0 : i32, i32
  }
  func.func @transform_2(%arg0: i32, %arg1: i32) -> (i32, i32) {
    %c0_i32 = arith.constant 0 : i32
    %c0_i32_0 = arith.constant 0 : i32
    %c0_i32_1 = arith.constant 0 : i32
    return %c0_i32, %c0_i32_0 : i32, i32
  }
  func.func @transform_3(%arg0: i32, %arg1: i32) -> (i32, i32) {
    %c0_i32 = arith.constant 0 : i32
    %c0_i32_0 = arith.constant 0 : i32
    %c0_i32_1 = arith.constant 0 : i32
    return %c0_i32, %c0_i32_0 : i32, i32
  }
  func.func @transform_4(%arg0: i32, %arg1: i32) -> (i32, i32) {
    %c0_i32 = arith.constant 0 : i32
    %c0_i32_0 = arith.constant 0 : i32
    return %arg0, %c0_i32 : i32, i32
  }
}

</mosaic_0001>

<bundles_post_ra>
// kernel: tpu_custom_call.1
= control target key start
LH: loop header
LB: loop body
LE: loop exit
PB: predicated region body
PF: predicated region fallthrough
CT: control target
= control target key end

     0   :  { %9 = vsyncpa [#allocation4], 0  ;;  %s1836_s0 = inlined_call_operand.hbm [shape: bf16[256,256], index: 0, kind: input, shape index: {}]   ;;  %s1837_s1 = inlined_call_operand.vmem [shape: bf16[256,16], index: 1, kind: input, shape index: {}]   ;;  %s1838_s2 = inlined_call_operand.vmem [shape: bf16[16,128], index: 2, kind: input, shape index: {}]   ;;  %s1839_s3 = inlined_call_operand.vmem [shape: f32[1,128], index: 3, kind: input, shape index: {}]   ;;  %s1840_s4 = inlined_call_operand.hbm [shape: bf16[256,128], index: 4, kind: output, shape index: {}]  }
   0x1   :  { %10 = vsyncpa [#allocation5], 0  ;;  %s1677_s15 = smov [#allocation3]   ;;  %s1629_s19 = scalar_lea.hbm %s1836_s0, 4096 }
   0x2   :  { %s16_s16 = sshll.u32 %s1677_s15, 4  ;;  %p1630_p0 = scmp.ne.s32.totalorder %s1836_s0, %s1629_s19  ;;  %s17_s16 = int_to_ptr.vmem [resolvable:$true] %s16_s16 }
   0x3   :  { %p1633_p1 = scmp.lt.u32.totalorder %s1629_s19, %s1836_s0 }
   0x5   :  { %p1635_p2 = pnand %p1633_p1, %p1630_p0 }
   0x7   :  { %1638 = shalt.err (!%p1635_p2)
}
   0x8   :  { %s1639_s24 = scalar_lea.vmem %s17_s16, 4096  ;;  %p1644_p4 = scmp.lt.s32.totalorder %s17_s16, %s17_s16 }
   0x9   :  { %p1640_p3 = scmp.ne.s32.totalorder %s17_s16, %s1639_s24  ;;  %p1645_p5 = scmp.lt.s32.totalorder %s1639_s24, %s1639_s24 }
   0xb   :  { %p1646_p6 = por %p1645_p5, %p1644_p4 }
   0xd   :  { %p1647_p7 = pnand %p1646_p6, %p1640_p3 }
   0xf   :  { %1650 = shalt.err (!%p1647_p7)
}
  0x10   :  { %s1678_s25 = smov 128   ;;  %s1679_s26 = smov 8  }
  0x11   :  { %22 = dma.hbm_to_vmem [thread:$0]  %s1836_s0, 4096, %s17_s16, [#allocation4], %s1678_s25, %s1678_s25, %s1679_s26  }
  0x12   :  { %1673 = dma.done.wait [#allocation4], 4096  }
  0x13   :  { %1674 = vsyncadd [#allocation4], 4294963200  ;;  %v1564_v0 = vld [vmem:[%s1838_s2] sm:$0xff]   ;;  %vm194_vm0 = vcmask 130048   ;;  %v1566_v2 = vld [vmem:[%s1837_s1 + $0x8] sm:$0xff]  }
  0x14   :  { %v1565_v1 = vld [vmem:[%s1837_s1] sm:$0xff]   ;;  %1508 = vmatprep.subr.bf16.mxu0 %v1564_v0  ;;  %v1567_v3 = vld [vmem:[%s1837_s1 + $0x10] sm:$0xff]   ;;  %v1568_v4 = vld [vmem:[%s1837_s1 + $0x18] sm:$0xff]  }
  0x15   :  { %1509 = vmatpush3.bf16.msra.mxu0 %v1564_v0  ;;  %1510 = vmatprep.mubr.msk.bf16.mxu0 %vm194_vm0, %v1565_v1  ;;  %v1569_v5 = vld [vmem:[%s1837_s1 + $0x20] sm:$0xff]   ;;  %v1570_v6 = vld [vmem:[%s1837_s1 + $0x28] sm:$0xff]   ;;  %v1571_v7 = vld [vmem:[%s1837_s1 + $0x30] sm:$0xff]  }
  0x16   :  { %v1572_v8 = vld [vmem:[%s1837_s1 + $0x38] sm:$0xff]   ;;  %v1573_v9 = vld [vmem:[%s1837_s1 + $0x40] sm:$0xff]   ;;  %v1574_v10 = vld [vmem:[%s1837_s1 + $0x48] sm:$0xff]  }
  0x17   :  { %v1575_v11 = vld [vmem:[%s1837_s1 + $0x50] sm:$0xff]   ;;  %v1576_v12 = vld [vmem:[%s1837_s1 + $0x58] sm:$0xff]   ;;  %v1577_v13 = vld [vmem:[%s1837_s1 + $0x60] sm:$0xff]  }
  0x18   :  { %1511 = vmatmul.mubr.msk.bf16.vlgmr.msra.gmra.mrb[0].mxu0 %vm194_vm0, %v1566_v2  ;;  %v1578_v14 = vld [vmem:[%s1837_s1 + $0x68] sm:$0xff]   ;;  %v1579_v15 = vld [vmem:[%s1837_s1 + $0x70] sm:$0xff]   ;;  %v1580_v16 = vld [vmem:[%s1837_s1 + $0x78] sm:$0xff]  }
  0x19   :  { %1514 = vmatprep.mubr.msk.bf16.mxu0 %vm194_vm0, %v1567_v3  ;;  %v1583_v17 = vld [vmem:[#allocation3 + $0x54] ss:$8 sps:$4 sm:$0xff]   ;;  %v1601_v18 = vld [vmem:[#allocation3 + $0x4] ss:$8 sps:$4 sm:$0xff]   ;;  %v1581_v3 = vld [vmem:[#allocation3 + $0x50] ss:$8 sps:$4 sm:$0xff]  }
  0x1a   :  { %716 = vmatprep.mubr.bf16.mxu1 %v1583_v17  ;;  %v1593_v17 = vld [vmem:[#allocation3 + $0x94] ss:$8 sps:$4 sm:$0xff]  }
  0x20   :  { %1515 = vmatmul.mubr.msk.bf16.gmra.mrb[4].mxu0 %vm194_vm0, %v1568_v4  ;;  %v1599_v4 = vld [vmem:[#allocation3] ss:$8 sps:$4 sm:$0xff]  }
  0x21   :  { %1518 = vmatprep.mubr.msk.bf16.mxu0 %vm194_vm0, %v1569_v5  ;;  %v1584_v5 = vld [vmem:[#allocation3 + $0x64] ss:$8 sps:$4 sm:$0xff]  }
  0x28   :  { %1519 = vmatmul.mubr.msk.bf16.gmra.mrb[8].mxu0 %vm194_vm0, %v1570_v6  ;;  %v1605_v6 = vld [vmem:[#allocation3 + $0x14] ss:$8 sps:$4 sm:$0xff]  }
  0x29   :  { %1522 = vmatprep.mubr.msk.bf16.mxu0 %vm194_vm0, %v1571_v7  ;;  %v1586_v7 = vld [vmem:[#allocation3 + $0x60] ss:$8 sps:$4 sm:$0xff]  }
  0x30   :  { %1523 = vmatmul.mubr.msk.bf16.gmra.mrb[12].mxu0 %vm194_vm0, %v1572_v8  ;;  %v1607_v8 = vld [vmem:[#allocation3 + $0x10] ss:$8 sps:$4 sm:$0xff]  }
  0x31   :  { %1526 = vmatprep.mubr.msk.bf16.mxu0 %vm194_vm0, %v1573_v9  ;;  %v1587_v9 = vld [vmem:[#allocation3 + $0x74] ss:$8 sps:$4 sm:$0xff]  }
  0x38   :  { %1527 = vmatmul.mubr.msk.bf16.gmra.mrb[16].mxu0 %vm194_vm0, %v1574_v10  ;;  %v1611_v10 = vld [vmem:[#allocation3 + $0x24] ss:$8 sps:$4 sm:$0xff]  }
  0x39   :  { %1530 = vmatprep.mubr.msk.bf16.mxu0 %vm194_vm0, %v1575_v11  ;;  %v1589_v11 = vld [vmem:[#allocation3 + $0x70] ss:$8 sps:$4 sm:$0xff]  }
  0x40   :  { %1531 = vmatmul.mubr.msk.bf16.gmra.mrb[20].mxu0 %vm194_vm0, %v1576_v12  ;;  %v1613_v12 = vld [vmem:[#allocation3 + $0x20] ss:$8 sps:$4 sm:$0xff]  }
  0x41   :  { %1534 = vmatprep.mubr.msk.bf16.mxu0 %vm194_vm0, %v1577_v13  ;;  %v1590_v13 = vld [vmem:[#allocation3 + $0x84] ss:$8 sps:$4 sm:$0xff]  }
  0x48   :  { %1535 = vmatmul.mubr.msk.bf16.gmra.mrb[24].mxu0 %vm194_vm0, %v1578_v14  ;;  %v1617_v14 = vld [vmem:[#allocation3 + $0x34] ss:$8 sps:$4 sm:$0xff]  }
  0x49   :  { %1538 = vmatprep.mubr.msk.bf16.mxu0 %vm194_vm0, %v1579_v15  ;;  %v1592_v15 = vld [vmem:[#allocation3 + $0x80] ss:$8 sps:$4 sm:$0xff]  }
  0x50   :  { %1539 = vmatmul.mubr.msk.bf16.gmra.mrb[28].mxu0 %vm194_vm0, %v1580_v16  ;;  %v1619_v16 = vld [vmem:[#allocation3 + $0x30] ss:$8 sps:$4 sm:$0xff]  }
  0x51   :  { %676 = vmatprep.mubr.bf16.mxu0 %v1601_v18  ;;  %v1623_v18 = vld [vmem:[#allocation3 + $0x44] ss:$8 sps:$4 sm:$0xff]  }
  0xeb   :  { %v1512_v19 = vpop.f32.mrb[0].mxu0 }
  0xec   :  { %v277_v20 = vpop.f32.mrb[1].mxu0 }
  0xed   :  { %v1513_v21 = vpop.f32.mrb[2].mxu0 }
  0xee   :  { %v405_v22 = vpack.c.bf16 %v1513_v21, %v1512_v19  ;;  %v280_v23 = vpop.f32.mrb[3].mxu0  ;;  %v1595_v19 = vld [vmem:[#allocation3 + $0x90] ss:$8 sps:$4 sm:$0xff]   ;;  %v1596_v21 = vld [vmem:[#allocation3 + $0xa4] ss:$8 sps:$4 sm:$0xff]  }
  0xef   :  { %v404_v24 = vpack.c.bf16 %v280_v23, %v277_v20  ;;  %v1625_v20 = vld [vmem:[#allocation3 + $0x40] ss:$8 sps:$4 sm:$0xff]   ;;  %v1602_v23 = vld [vmem:[#allocation3 + $0xb4] ss:$8 sps:$4 sm:$0xff]  }
  0xf3   :  { %v1516_v25 = vpop.f32.mrb[4].mxu0 }
  0xf4   :  { %v293_v26 = vpop.f32.mrb[5].mxu0 }
  0xf5   :  { %v1517_v27 = vpop.f32.mrb[6].mxu0 }
  0xf6   :  { %v407_v28 = vpack.c.bf16 %v1517_v27, %v1516_v25  ;;  %v296_v29 = vpop.f32.mrb[7].mxu0  ;;  %v1608_v25 = vld [vmem:[#allocation3 + $0xc4] ss:$8 sps:$4 sm:$0xff]   ;;  %v1614_v27 = vld [vmem:[#allocation3 + $0xd4] ss:$8 sps:$4 sm:$0xff]  }
  0xf7   :  { %v406_v30 = vpack.c.bf16 %v296_v29, %v293_v26  ;;  %v1610_v26 = vld [vmem:[#allocation3 + $0xc0] ss:$8 sps:$4 sm:$0xff]   ;;  %v1620_v29 = vld [vmem:[#allocation3 + $0xe4] ss:$8 sps:$4 sm:$0xff]  }
  0xfb   :  { %v1520_v31 = vpop.f32.mrb[8].mxu0 }
  0xfc   :  { %v309_v32 = vpop.f32.mrb[9].mxu0 }
  0xfd   :  { %v1521_v33 = vpop.f32.mrb[10].mxu0 }
  0xfe   :  { %v409_v34 = vpack.c.bf16 %v1521_v33, %v1520_v31  ;;  %v312_v35 = vpop.f32.mrb[11].mxu0  ;;  %v1626_v31 = vld [vmem:[#allocation3 + $0xf4] ss:$8 sps:$4 sm:$0xff]  }
  0xff   :  { %v408_v36 = vpack.c.bf16 %v312_v35, %v309_v32  ;;  %v1628_v32 = vld [vmem:[#allocation3 + $0xf0] ss:$8 sps:$4 sm:$0xff]  }
 0x103   :  { %v1524_v37 = vpop.f32.mrb[12].mxu0 }
 0x104   :  { %v325_v38 = vpop.f32.mrb[13].mxu0 }
 0x105   :  { %v1525_v39 = vpop.f32.mrb[14].mxu0 }
 0x106   :  { %v411_v40 = vpack.c.bf16 %v1525_v39, %v1524_v37  ;;  %v328_v41 = vpop.f32.mrb[15].mxu0 }
 0x107   :  { %v410_v42 = vpack.c.bf16 %v328_v41, %v325_v38 }
 0x10b   :  { %v1528_v43 = vpop.f32.mrb[16].mxu0 }
 0x10c   :  { %v341_v44 = vpop.f32.mrb[17].mxu0 }
 0x10d   :  { %v1529_v45 = vpop.f32.mrb[18].mxu0 }
 0x10e   :  { %v413_v46 = vpack.c.bf16 %v1529_v45, %v1528_v43  ;;  %v344_v47 = vpop.f32.mrb[19].mxu0 }
 0x10f   :  { %v412_v48 = vpack.c.bf16 %v344_v47, %v341_v44 }
 0x111   :  { %1396 = vmatprep.subr.bf16.mxu0 %v412_v48  ;;  %1542 = vmatprep.subr.bf16.mxu1 %v412_v48 }
 0x112   :  { %1397 = vmatpush3.bf16.msra.mxu0 %v404_v24  ;;  %1550 = vmatpush3.bf16.msra.mxu1 %v404_v24  ;;  %v1604_v24 = vld [vmem:[#allocation3 + $0xb0] ss:$8 sps:$4 sm:$0xff]  }
 0x113   :  { %v1532_v49 = vpop.f32.mrb[20].mxu0  ;;  %1398 = vmatprep.subr.bf16.mxu0 %v413_v46  ;;  %1543 = vmatprep.subr.bf16.mxu1 %v413_v46 }
 0x114   :  { %v357_v50 = vpop.f32.mrb[21].mxu0 }
 0x115   :  { %v1533_v51 = vpop.f32.mrb[22].mxu0 }
 0x116   :  { %v415_v52 = vpack.c.bf16 %v1533_v51, %v1532_v49  ;;  %v360_v53 = vpop.f32.mrb[23].mxu0  ;;  %1399 = vmatpush3.bf16.msra.mxu0 %v405_v22  ;;  %1551 = vmatpush3.bf16.msra.mxu1 %v405_v22  ;;  %v1598_v22 = vld [vmem:[#allocation3 + $0xa0] ss:$8 sps:$4 sm:$0xff]  }
 0x117   :  { %v414_v54 = vpack.c.bf16 %v360_v53, %v357_v50 }
 0x119   :  { %1400 = vmatprep.subr.bf16.mxu0 %v414_v54  ;;  %1544 = vmatprep.subr.bf16.mxu1 %v414_v54 }
 0x11a   :  { %1401 = vmatpush3.bf16.msra.mxu0 %v406_v30  ;;  %1552 = vmatpush3.bf16.msra.mxu1 %v406_v30  ;;  %v1622_v30 = vld [vmem:[#allocation3 + $0xe0] ss:$8 sps:$4 sm:$0xff]  }
 0x11b   :  { %v1536_v55 = vpop.f32.mrb[24].mxu0  ;;  %1402 = vmatprep.subr.bf16.mxu0 %v415_v52  ;;  %1545 = vmatprep.subr.bf16.mxu1 %v415_v52 }
 0x11c   :  { %v373_v56 = vpop.f32.mrb[25].mxu0 }
 0x11d   :  { %v1537_v57 = vpop.f32.mrb[26].mxu0 }
 0x11e   :  { %v417_v58 = vpack.c.bf16 %v1537_v57, %v1536_v55  ;;  %v376_v59 = vpop.f32.mrb[27].mxu0  ;;  %1403 = vmatpush3.bf16.msra.mxu0 %v407_v28  ;;  %1553 = vmatpush3.bf16.msra.mxu1 %v407_v28  ;;  %v1616_v28 = vld [vmem:[#allocation3 + $0xd0] ss:$8 sps:$4 sm:$0xff]  }
 0x11f   :  { %v416_v60 = vpack.c.bf16 %v376_v59, %v373_v56 }
 0x121   :  { %1404 = vmatprep.subr.bf16.mxu0 %v416_v60  ;;  %1546 = vmatprep.subr.bf16.mxu1 %v416_v60 }
 0x122   :  { %1405 = vmatpush3.bf16.msra.mxu0 %v408_v36  ;;  %1554 = vmatpush3.bf16.msra.mxu1 %v408_v36  ;;  %v1790_v36 = vld [vmem:[%s1839_s3] ss:$0 sm:$0xff]  ;;  %s1680_s3 = smov [#allocation6]  }
 0x123   :  { %v1540_v61 = vpop.f32.mrb[28].mxu0  ;;  %1406 = vmatprep.subr.bf16.mxu0 %v417_v58  ;;  %1547 = vmatprep.subr.bf16.mxu1 %v417_v58  ;;  %s1140_s9 = sshll.u32 %s1680_s3, 4  ;;  %s1141_s9 = int_to_ptr.vmem [resolvable:$true] %s1140_s9 }
 0x124   :  { %v389_v62 = vpop.f32.mrb[29].mxu0  ;;  %s1651_s2 = scalar_lea.vmem %s1141_s9, 2048  ;;  %p1656_p9 = scmp.lt.s32.totalorder %s1141_s9, %s1141_s9 }
 0x125   :  { %v1541_v63 = vpop.f32.mrb[30].mxu0  ;;  %p1652_p8 = scmp.ne.s32.totalorder %s1141_s9, %s1651_s2  ;;  %p1657_p10 = scmp.lt.s32.totalorder %s1651_s2, %s1651_s2 }
 0x126   :  { %v419_v0 = vpack.c.bf16 %v1541_v63, %v1540_v61  ;;  %v392_v1 = vpop.f32.mrb[31].mxu0  ;;  %1407 = vmatpush3.bf16.msra.mxu0 %v409_v34  ;;  %1555 = vmatpush3.bf16.msra.mxu1 %v409_v34 }
 0x127   :  { %v418_v2 = vpack.c.bf16 %v392_v1, %v389_v62  ;;  %p1658_p11 = por %p1657_p10, %p1656_p9 }
 0x129   :  { %1408 = vmatprep.subr.bf16.mxu0 %v418_v2  ;;  %1548 = vmatprep.subr.bf16.mxu1 %v418_v2  ;;  %p1659_p12 = pnand %p1658_p11, %p1652_p8 }
 0x12a   :  { %1409 = vmatpush3.bf16.msra.mxu0 %v410_v42  ;;  %1556 = vmatpush3.bf16.msra.mxu1 %v410_v42 }
 0x12b   :  { %1410 = vmatprep.subr.bf16.mxu0 %v419_v0  ;;  %1549 = vmatprep.subr.bf16.mxu1 %v419_v0 }
 0x12e   :  { %1411 = vmatpush3.bf16.msra.mxu0 %v411_v40  ;;  %1557 = vmatpush3.bf16.msra.mxu1 %v411_v40 }
 0x131   :  { %717 = vmatmul.mubr.bf16.vlgmr.msra.gmra.mrb[0].mxu1 %v1581_v3  ;;  %677 = vmatmul.mubr.bf16.vlgmr.msra.gmra.mrb[32].mxu0 %v1599_v4 }
 0x132   :  { %724 = vmatprep.mubr.bf16.mxu1 %v1584_v5  ;;  %684 = vmatprep.mubr.bf16.mxu0 %v1605_v6 }
 0x139   :  { %725 = vmatmul.mubr.bf16.gmra.mrb[4].mxu1 %v1586_v7  ;;  %685 = vmatmul.mubr.bf16.gmra.mrb[36].mxu0 %v1607_v8 }
 0x13a   :  { %732 = vmatprep.mubr.bf16.mxu1 %v1587_v9  ;;  %692 = vmatprep.mubr.bf16.mxu0 %v1611_v10 }
 0x141   :  { %733 = vmatmul.mubr.bf16.gmra.mrb[8].mxu1 %v1589_v11  ;;  %693 = vmatmul.mubr.bf16.gmra.mrb[40].mxu0 %v1613_v12 }
 0x142   :  { %740 = vmatprep.mubr.bf16.mxu1 %v1590_v13  ;;  %700 = vmatprep.mubr.bf16.mxu0 %v1617_v14 }
 0x149   :  { %741 = vmatmul.mubr.bf16.gmra.mrb[12].mxu1 %v1592_v15  ;;  %701 = vmatmul.mubr.bf16.gmra.mrb[44].mxu0 %v1619_v16 }
 0x14a   :  { %748 = vmatprep.mubr.bf16.mxu1 %v1593_v17  ;;  %708 = vmatprep.mubr.bf16.mxu0 %v1623_v18 }
 0x151   :  { %749 = vmatmul.mubr.bf16.gmra.mrb[16].mxu1 %v1595_v19  ;;  %709 = vmatmul.mubr.bf16.gmra.mrb[48].mxu0 %v1625_v20 }
 0x152   :  { %756 = vmatprep.mubr.bf16.mxu1 %v1596_v21 }
 0x159   :  { %757 = vmatmul.mubr.bf16.gmra.mrb[20].mxu1 %v1598_v22 }
 0x15a   :  { %764 = vmatprep.mubr.bf16.mxu1 %v1602_v23 }
 0x161   :  { %765 = vmatmul.mubr.bf16.gmra.mrb[24].mxu1 %v1604_v24 }
 0x162   :  { %772 = vmatprep.mubr.bf16.mxu1 %v1608_v25 }
 0x169   :  { %773 = vmatmul.mubr.bf16.gmra.mrb[28].mxu1 %v1610_v26 }
 0x16a   :  { %780 = vmatprep.mubr.bf16.mxu1 %v1614_v27 }
 0x171   :  { %781 = vmatmul.mubr.bf16.gmra.mrb[32].mxu1 %v1616_v28 }
 0x172   :  { %788 = vmatprep.mubr.bf16.mxu1 %v1620_v29 }
 0x179   :  { %789 = vmatmul.mubr.bf16.gmra.mrb[36].mxu1 %v1622_v30 }
 0x17a   :  { %796 = vmatprep.mubr.bf16.mxu1 %v1626_v31 }
 0x181   :  { %797 = vmatmul.mubr.bf16.gmra.mrb[40].mxu1 %v1628_v32 }
 0x204   :  { %v1442_v33 = vpop.f32.mrb[0].mxu1  ;;  %v1412_v34 = vpop.f32.mrb[32].mxu0 }
 0x205   :  { %v1443_v35 = vpop.f32.mrb[1].mxu1  ;;  %v1413_v37 = vpop.f32.mrb[33].mxu0 }
 0x206   :  { %v1444_v38 = vadd.f32 %v1443_v35, %v1442_v33  ;;  %v1445_v39 = vpop.f32.mrb[2].mxu1  ;;  %v1414_v40 = vadd.f32 %v1413_v37, %v1412_v34  ;;  %v1415_v41 = vpop.f32.mrb[34].mxu0 }
 0x207   :  { %v1446_v42 = vpop.f32.mrb[3].mxu1  ;;  %v1416_v43 = vpop.f32.mrb[35].mxu0 }
 0x208   :  { %v921_v44 = vadd.f32 %v1444_v38, %v1790_v36  ;;  %v1447_v45 = vadd.f32 %v1446_v42, %v1445_v39  ;;  %v911_v46 = vadd.f32 %v1414_v40, %v1790_v36  ;;  %v1417_v47 = vadd.f32 %v1416_v43, %v1415_v41 }
 0x20a   :  { %v922_v48 = vadd.f32 %v1447_v45, %v1790_v36  ;;  %v943_v49 = vmax.f32 %v911_v46, 0.0  ;;  %v912_v50 = vadd.f32 %v1417_v47, %v1790_v36  ;;  %v953_v51 = vmax.f32 %v921_v44, 0.0 }
 0x20c   :  { %v954_v52 = vmax.f32 %v922_v48, 0.0  ;;  %v1448_v53 = vpop.f32.mrb[4].mxu1  ;;  %v944_v54 = vmax.f32 %v912_v50, 0.0  ;;  %v1418_v55 = vpop.f32.mrb[36].mxu0 }
 0x20d   :  { %v1449_v56 = vpop.f32.mrb[5].mxu1  ;;  %v1419_v57 = vpop.f32.mrb[37].mxu0 }
 0x20e   :  { %v1312_v58 = vpack.c.bf16 %v954_v52, %v953_v51  ;;  %v1450_v59 = vadd.f32 %v1449_v56, %v1448_v53  ;;  %v1451_v60 = vpop.f32.mrb[6].mxu1  ;;  %v1287_v61 = vpack.c.bf16 %v944_v54, %v943_v49  ;;  %v1420_v62 = vadd.f32 %v1419_v57, %v1418_v55  ;;  %v1421_v63 = vpop.f32.mrb[38].mxu0 }
 0x20f   :  { %v1452_v0 = vpop.f32.mrb[7].mxu1  ;;  %v1422_v1 = vpop.f32.mrb[39].mxu0 }
 0x210   :  { %1368 = vst [vmem:[#allocation6 + $0x28] sm:$0xff] %v1312_v58   ;;  %v923_v2 = vadd.f32 %v1450_v59, %v1790_v36  ;;  %v1453_v3 = vadd.f32 %v1452_v0, %v1451_v60  ;;  %1288 = vst [vmem:[#allocation6] sm:$0xff] %v1287_v61   ;;  %v913_v4 = vadd.f32 %v1420_v62, %v1790_v36 }
 0x211   :  { %v1423_v5 = vadd.f32 %v1422_v1, %v1421_v63 }
 0x212   :  { %v924_v6 = vadd.f32 %v1453_v3, %v1790_v36  ;;  %v945_v7 = vmax.f32 %v913_v4, 0.0  ;;  %v955_v9 = vmax.f32 %v923_v2, 0.0 }
 0x213   :  { %v914_v8 = vadd.f32 %v1423_v5, %v1790_v36 }
 0x214   :  { %v956_v10 = vmax.f32 %v924_v6, 0.0  ;;  %v1454_v11 = vpop.f32.mrb[8].mxu1  ;;  %v1424_v13 = vpop.f32.mrb[40].mxu0 }
 0x215   :  { %v946_v12 = vmax.f32 %v914_v8, 0.0  ;;  %v1455_v14 = vpop.f32.mrb[9].mxu1  ;;  %v1425_v15 = vpop.f32.mrb[41].mxu0 }
 0x216   :  { %v1317_v16 = vpack.c.bf16 %v956_v10, %v955_v9  ;;  %v1456_v17 = vadd.f32 %v1455_v14, %v1454_v11  ;;  %v1457_v18 = vpop.f32.mrb[10].mxu1  ;;  %v1426_v20 = vadd.f32 %v1425_v15, %v1424_v13  ;;  %v1427_v21 = vpop.f32.mrb[42].mxu0 }
 0x217   :  { %v1292_v19 = vpack.c.bf16 %v946_v12, %v945_v7  ;;  %v1458_v22 = vpop.f32.mrb[11].mxu1  ;;  %v1428_v23 = vpop.f32.mrb[43].mxu0 }
 0x218   :  { %1369 = vst [vmem:[#allocation6 + $0x30] sm:$0xff] %v1317_v16   ;;  %v925_v24 = vadd.f32 %v1456_v17, %v1790_v36  ;;  %v1459_v25 = vadd.f32 %v1458_v22, %v1457_v18  ;;  %v915_v26 = vadd.f32 %v1426_v20, %v1790_v36  ;;  %v1429_v27 = vadd.f32 %v1428_v23, %v1427_v21 }
 0x219   :  { %1364 = vst [vmem:[#allocation6 + $0x8] sm:$0xff] %v1292_v19  }
 0x21a   :  { %v926_v28 = vadd.f32 %v1459_v25, %v1790_v36  ;;  %v947_v29 = vmax.f32 %v915_v26, 0.0  ;;  %v916_v30 = vadd.f32 %v1429_v27, %v1790_v36  ;;  %v957_v31 = vmax.f32 %v925_v24, 0.0 }
 0x21c   :  { %v958_v32 = vmax.f32 %v926_v28, 0.0  ;;  %v1460_v33 = vpop.f32.mrb[12].mxu1  ;;  %v948_v34 = vmax.f32 %v916_v30, 0.0  ;;  %v1430_v35 = vpop.f32.mrb[44].mxu0 }
 0x21d   :  { %v1461_v37 = vpop.f32.mrb[13].mxu1  ;;  %v1431_v38 = vpop.f32.mrb[45].mxu0 }
 0x21e   :  { %v1322_v39 = vpack.c.bf16 %v958_v32, %v957_v31  ;;  %v1462_v40 = vadd.f32 %v1461_v37, %v1460_v33  ;;  %v1463_v41 = vpop.f32.mrb[14].mxu1  ;;  %v1297_v42 = vpack.c.bf16 %v948_v34, %v947_v29  ;;  %v1432_v43 = vadd.f32 %v1431_v38, %v1430_v35  ;;  %v1433_v44 = vpop.f32.mrb[46].mxu0 }
 0x21f   :  { %v1464_v45 = vpop.f32.mrb[15].mxu1  ;;  %v1434_v46 = vpop.f32.mrb[47].mxu0 }
 0x220   :  { %1370 = vst [vmem:[#allocation6 + $0x38] sm:$0xff] %v1322_v39   ;;  %v927_v47 = vadd.f32 %v1462_v40, %v1790_v36  ;;  %v1465_v48 = vadd.f32 %v1464_v45, %v1463_v41  ;;  %1365 = vst [vmem:[#allocation6 + $0x10] sm:$0xff] %v1297_v42   ;;  %v917_v49 = vadd.f32 %v1432_v43, %v1790_v36 }
 0x221   :  { %v1435_v50 = vadd.f32 %v1434_v46, %v1433_v44 }
 0x222   :  { %v928_v51 = vadd.f32 %v1465_v48, %v1790_v36  ;;  %v949_v52 = vmax.f32 %v917_v49, 0.0  ;;  %v959_v54 = vmax.f32 %v927_v47, 0.0 }
 0x223   :  { %v918_v53 = vadd.f32 %v1435_v50, %v1790_v36 }
 0x224   :  { %v960_v55 = vmax.f32 %v928_v51, 0.0  ;;  %v1466_v56 = vpop.f32.mrb[16].mxu1  ;;  %v1436_v58 = vpop.f32.mrb[48].mxu0 }
 0x225   :  { %v950_v57 = vmax.f32 %v918_v53, 0.0  ;;  %v1467_v59 = vpop.f32.mrb[17].mxu1  ;;  %v1437_v60 = vpop.f32.mrb[49].mxu0 }
 0x226   :  { %v1327_v61 = vpack.c.bf16 %v960_v55, %v959_v54  ;;  %v1468_v62 = vadd.f32 %v1467_v59, %v1466_v56  ;;  %v1469_v63 = vpop.f32.mrb[18].mxu1  ;;  %v1438_v1 = vadd.f32 %v1437_v60, %v1436_v58  ;;  %v1439_v2 = vpop.f32.mrb[50].mxu0 }
 0x227   :  { %v1302_v0 = vpack.c.bf16 %v950_v57, %v949_v52  ;;  %v1470_v3 = vpop.f32.mrb[19].mxu1  ;;  %v1440_v4 = vpop.f32.mrb[51].mxu0 }
 0x228   :  { %1371 = vst [vmem:[#allocation6 + $0x40] sm:$0xff] %v1327_v61   ;;  %v929_v5 = vadd.f32 %v1468_v62, %v1790_v36  ;;  %v1471_v6 = vadd.f32 %v1470_v3, %v1469_v63  ;;  %v919_v7 = vadd.f32 %v1438_v1, %v1790_v36  ;;  %v1441_v8 = vadd.f32 %v1440_v4, %v1439_v2 }
 0x229   :  { %1366 = vst [vmem:[#allocation6 + $0x18] sm:$0xff] %v1302_v0  }
 0x22a   :  { %v930_v9 = vadd.f32 %v1471_v6, %v1790_v36  ;;  %v951_v10 = vmax.f32 %v919_v7, 0.0  ;;  %v920_v11 = vadd.f32 %v1441_v8, %v1790_v36  ;;  %v961_v12 = vmax.f32 %v929_v5, 0.0 }
 0x22c   :  { %v962_v13 = vmax.f32 %v930_v9, 0.0  ;;  %v1472_v14 = vpop.f32.mrb[20].mxu1  ;;  %v952_v15 = vmax.f32 %v920_v11, 0.0 }
 0x22d   :  { %v1473_v16 = vpop.f32.mrb[21].mxu1 }
 0x22e   :  { %v1332_v17 = vpack.c.bf16 %v962_v13, %v961_v12  ;;  %v1474_v18 = vadd.f32 %v1473_v16, %v1472_v14  ;;  %v1475_v19 = vpop.f32.mrb[22].mxu1  ;;  %v1307_v20 = vpack.c.bf16 %v952_v15, %v951_v10 }
 0x22f   :  { %v1476_v21 = vpop.f32.mrb[23].mxu1 }
 0x230   :  { %1372 = vst [vmem:[#allocation6 + $0x48] sm:$0xff] %v1332_v17   ;;  %v931_v22 = vadd.f32 %v1474_v18, %v1790_v36  ;;  %v1477_v23 = vadd.f32 %v1476_v21, %v1475_v19  ;;  %1367 = vst [vmem:[#allocation6 + $0x20] sm:$0xff] %v1307_v20  }
 0x232   :  { %v932_v24 = vadd.f32 %v1477_v23, %v1790_v36  ;;  %v963_v25 = vmax.f32 %v931_v22, 0.0 }
 0x234   :  { %v964_v26 = vmax.f32 %v932_v24, 0.0  ;;  %v1478_v27 = vpop.f32.mrb[24].mxu1 }
 0x235   :  { %v1479_v28 = vpop.f32.mrb[25].mxu1 }
 0x236   :  { %v1337_v29 = vpack.c.bf16 %v964_v26, %v963_v25  ;;  %v1480_v30 = vadd.f32 %v1479_v28, %v1478_v27  ;;  %v1481_v31 = vpop.f32.mrb[26].mxu1 }
 0x237   :  { %v1482_v32 = vpop.f32.mrb[27].mxu1 }
 0x238   :  { %1373 = vst [vmem:[#allocation6 + $0x50] sm:$0xff] %v1337_v29   ;;  %v933_v33 = vadd.f32 %v1480_v30, %v1790_v36  ;;  %v1483_v34 = vadd.f32 %v1482_v32, %v1481_v31 }
 0x23a   :  { %v934_v35 = vadd.f32 %v1483_v34, %v1790_v36  ;;  %v965_v37 = vmax.f32 %v933_v33, 0.0 }
 0x23c   :  { %v966_v38 = vmax.f32 %v934_v35, 0.0  ;;  %v1484_v39 = vpop.f32.mrb[28].mxu1 }
 0x23d   :  { %v1485_v40 = vpop.f32.mrb[29].mxu1 }
 0x23e   :  { %v1342_v41 = vpack.c.bf16 %v966_v38, %v965_v37  ;;  %v1486_v42 = vadd.f32 %v1485_v40, %v1484_v39  ;;  %v1487_v43 = vpop.f32.mrb[30].mxu1 }
 0x23f   :  { %v1488_v44 = vpop.f32.mrb[31].mxu1 }
 0x240   :  { %1374 = vst [vmem:[#allocation6 + $0x58] sm:$0xff] %v1342_v41   ;;  %v935_v45 = vadd.f32 %v1486_v42, %v1790_v36  ;;  %v1489_v46 = vadd.f32 %v1488_v44, %v1487_v43 }
 0x242   :  { %v936_v47 = vadd.f32 %v1489_v46, %v1790_v36  ;;  %v967_v48 = vmax.f32 %v935_v45, 0.0 }
 0x244   :  { %v968_v49 = vmax.f32 %v936_v47, 0.0  ;;  %v1490_v50 = vpop.f32.mrb[32].mxu1 }
 0x245   :  { %v1491_v51 = vpop.f32.mrb[33].mxu1 }
 0x246   :  { %v1347_v52 = vpack.c.bf16 %v968_v49, %v967_v48  ;;  %v1492_v53 = vadd.f32 %v1491_v51, %v1490_v50  ;;  %v1493_v54 = vpop.f32.mrb[34].mxu1 }
 0x247   :  { %v1494_v55 = vpop.f32.mrb[35].mxu1 }
 0x248   :  { %1375 = vst [vmem:[#allocation6 + $0x60] sm:$0xff] %v1347_v52   ;;  %v937_v56 = vadd.f32 %v1492_v53, %v1790_v36  ;;  %v1495_v57 = vadd.f32 %v1494_v55, %v1493_v54 }
 0x24a   :  { %v938_v58 = vadd.f32 %v1495_v57, %v1790_v36  ;;  %v969_v59 = vmax.f32 %v937_v56, 0.0 }
 0x24c   :  { %v970_v60 = vmax.f32 %v938_v58, 0.0  ;;  %v1496_v61 = vpop.f32.mrb[36].mxu1 }
 0x24d   :  { %v1497_v62 = vpop.f32.mrb[37].mxu1 }
 0x24e   :  { %v1352_v63 = vpack.c.bf16 %v970_v60, %v969_v59  ;;  %v1498_v0 = vadd.f32 %v1497_v62, %v1496_v61  ;;  %v1499_v1 = vpop.f32.mrb[38].mxu1 }
 0x24f   :  { %v1500_v2 = vpop.f32.mrb[39].mxu1 }
 0x250   :  { %1376 = vst [vmem:[#allocation6 + $0x68] sm:$0xff] %v1352_v63   ;;  %v939_v3 = vadd.f32 %v1498_v0, %v1790_v36  ;;  %v1501_v4 = vadd.f32 %v1500_v2, %v1499_v1 }
 0x252   :  { %v940_v5 = vadd.f32 %v1501_v4, %v1790_v36  ;;  %v971_v6 = vmax.f32 %v939_v3, 0.0 }
 0x254   :  { %v972_v7 = vmax.f32 %v940_v5, 0.0  ;;  %v1502_v8 = vpop.f32.mrb[40].mxu1 }
 0x255   :  { %v1503_v9 = vpop.f32.mrb[41].mxu1 }
 0x256   :  { %v1357_v10 = vpack.c.bf16 %v972_v7, %v971_v6  ;;  %v1504_v11 = vadd.f32 %v1503_v9, %v1502_v8  ;;  %v1505_v12 = vpop.f32.mrb[42].mxu1 }
 0x257   :  { %v1506_v13 = vpop.f32.mrb[43].mxu1 }
 0x258   :  { %1377 = vst [vmem:[#allocation6 + $0x70] sm:$0xff] %v1357_v10   ;;  %v941_v14 = vadd.f32 %v1504_v11, %v1790_v36  ;;  %v1507_v15 = vadd.f32 %v1506_v13, %v1505_v12 }
 0x25a   :  { %v942_v16 = vadd.f32 %v1507_v15, %v1790_v36  ;;  %v973_v17 = vmax.f32 %v941_v14, 0.0 }
 0x25c   :  { %v974_v18 = vmax.f32 %v942_v16, 0.0 }
 0x25e   :  { %v1362_v19 = vpack.c.bf16 %v974_v18, %v973_v17 }
 0x260   :  { %1378 = vst [vmem:[#allocation6 + $0x78] sm:$0xff] %v1362_v19  }
 0x261   :  { %1662 = shalt.err (!%p1659_p12)
}
 0x262   :  { %s1663_s12 = scalar_lea.hbm %s1840_s4, 2048 }
 0x263   :  { %p1664_p13 = scmp.ne.s32.totalorder %s1840_s4, %s1663_s12  ;;  %p1667_p0 = scmp.lt.u32.totalorder %s1663_s12, %s1840_s4 }
 0x265   :  { %p1669_p1 = pnand %p1667_p0, %p1664_p13 }
 0x267   :  { %1672 = shalt.err (!%p1669_p1)
}
 0x268   :  { %s1681_s17 = smov 64   ;;  %s1682_s18 = smov 4  }
 0x269   :  { %1146 = dma.vmem_to_hbm [thread:$0]  %s1141_s9, 2048, %s1840_s4, [#allocation5], %s1681_s17, %s1681_s17, %s1682_s18  }
 0x26a   :  { %1675 = dma.done.wait [#allocation5], 2048  }
 0x26b   :  { %1676 = vsyncadd [#allocation5], 4294965248 }
 0x26c   :  { %1150 = vsyncpa [#allocation4], 1 }
 0x26d   :  { %1151 = vsyncpa [#allocation5], 1 }

</bundles_post_ra>
